<compile_context>
chip_gen: v7x
topology: tpu7x:2x2x1
jax: 0.10.0
libtpu: 0.0.40
codegen_flags: <defaults>
</compile_context>

<pallas_src>
import functools
import math

import jax
import jax.numpy as jnp
from jax.experimental import pallas as pl
from jax.experimental.pallas import tpu as pltpu

_LANE = 128
_LN_EPS = 1e-5


def _round_up(x, m):
    return (x + m - 1) // m * m


def _patch_embed_kernel(x_ref, w_ref, posb_ref, g_ref, b_ref, o_ref, *, d_real):
    # x_ref:    (TM, D_in)   row tile (batch folded into M)
    # w_ref:    (D_in, Dp)   projection weights, model dim padded to 128-mult
    # posb_ref: (TM, Dp)     pos_emb rows + bias, tiled to the row tile
    # g_ref/b_ref: (1, Dp)   LayerNorm gamma / beta
    proj = jnp.dot(x_ref[...], w_ref[...], preferred_element_type=jnp.float32)
    summed = proj + posb_ref[...]                     # (TM, Dp), f32

    # Single-pass LayerNorm stats over the *real* model dim. Padded lanes of
    # `summed` are exactly zero (zero-padded W / pos / bias), so the sums over
    # the padded Dp equal the sums over the real D lanes.
    inv_d = jnp.float32(1.0 / d_real)
    s1 = jnp.sum(summed, axis=-1, keepdims=True)
    s2 = jnp.sum(summed * summed, axis=-1, keepdims=True)
    mean = s1 * inv_d
    var = s2 * inv_d - mean * mean
    inv_std = jax.lax.rsqrt(var + _LN_EPS)

    out = (summed - mean) * inv_std * g_ref[...] + b_ref[...]
    o_ref[...] = out.astype(o_ref.dtype)


def patch_embedding_forward(x, w_patch, b_patch, pos_table, gamma, beta,
                            *, operand_dtype=jnp.float32, target_rows=256):
    """x: (B, S, D_in). w_patch: (D_in, D). pos_table: (S+1, D). Returns (B, S, D) f32."""
    B, S, D_in = x.shape
    D = w_patch.shape[1]
    Dp = _round_up(D, _LANE)

    # --- row tiling: TB whole sequences per grid step (TM = TB * S rows) ----
    TB = max(1, min(B, max(1, target_rows // S)))
    if (TB * S) % 8 != 0:                       # keep row tile sublane-aligned
        TB *= 8 // math.gcd(TB * S, 8)
    B_pad = _round_up(B, TB)
    if B_pad != B:
        x = jnp.pad(x, ((0, B_pad - B), (0, 0), (0, 0)))
    TM = TB * S
    N_pad = B_pad * S
    grid = (N_pad // TM,)

    # --- parameter prep: fold bias into pos rows, pad model dim to 128 ------
    posb = pos_table[:S] + b_patch[None, :]            # (S, D)
    pad_d = Dp - D
    if pad_d:
        w_p = jnp.pad(w_patch, ((0, 0), (0, pad_d)))
        posb = jnp.pad(posb, ((0, 0), (0, pad_d)))
        g_p = jnp.pad(gamma, (0, pad_d))
        be_p = jnp.pad(beta, (0, pad_d))
    else:
        w_p, g_p, be_p = w_patch, gamma, beta

    x2 = x.reshape(N_pad, D_in).astype(operand_dtype)          # (N_pad, D_in)
    w_op = w_p.astype(operand_dtype)                            # (D_in, Dp)
    posb_tiled = jnp.tile(posb, (TB, 1)).astype(jnp.float32)    # (TM, Dp), const block
    g2 = g_p.reshape(1, Dp).astype(jnp.float32)
    be2 = be_p.reshape(1, Dp).astype(jnp.float32)

    kernel = functools.partial(_patch_embed_kernel, d_real=D)

    out = pl.pallas_call(
        kernel,
        out_shape=jax.ShapeDtypeStruct((N_pad, Dp), jnp.float32),
        grid_spec=pltpu.PrefetchScalarGridSpec(
            num_scalar_prefetch=0,
            grid=grid,
            in_specs=[
                pl.BlockSpec((TM, D_in), lambda i: (i, 0)),   # x row tile
                pl.BlockSpec((D_in, Dp), lambda i: (0, 0)),   # W (resident)
                pl.BlockSpec((TM, Dp), lambda i: (0, 0)),     # pos+bias (resident)
                pl.BlockSpec((1, Dp), lambda i: (0, 0)),      # gamma
                pl.BlockSpec((1, Dp), lambda i: (0, 0)),      # beta
            ],
            out_specs=pl.BlockSpec((TM, Dp), lambda i: (i, 0)),
        ),
        compiler_params=pltpu.CompilerParams(
            dimension_semantics=("parallel",),
            vmem_limit_bytes=32 * 1024 * 1024,
        ),
    )(x2, w_op, posb_tiled, g2, be2)

    # drop row padding and lane padding, restore (B, S, D)
    return out[:B * S, :D].reshape(B, S, D)


def reference_forward(x, w_patch, b_patch, pos_table, gamma, beta):
    B, S, _ = x.shape
    proj = jnp.einsum("bsi,id->bsd", x, w_patch) + b_patch
    summed = proj + pos_table[:S][None, :, :]
    mean = jnp.mean(summed, axis=-1, keepdims=True)
    var = jnp.mean((summed - mean) ** 2, axis=-1, keepdims=True)
    normed = (summed - mean) / jnp.sqrt(var + 1e-5)
    return normed * gamma + beta


if __name__ == "__main__":
    # Module config (small): height=8, width=8, channel=3, patch=2, d_model=32
    height, width, channel, patch, d_model = 8, 8, 3, 2, 32
    patch_size = patch ** 2                       # 4
    seq_length = (height * width) // patch_size   # 16
    input_dim = patch_size * channel              # 12
    batch = 2

    key = jax.random.PRNGKey(0)
    k_x, k_w, k_b, k_pos, k_g, k_be = jax.random.split(key, 6)

    x = jax.random.normal(k_x, (batch, seq_length, input_dim), jnp.float32)
    w_patch = jax.random.normal(k_w, (input_dim, d_model), jnp.float32) * 0.05
    b_patch = jax.random.normal(k_b, (d_model,), jnp.float32) * 0.05
    pos_table = jax.random.normal(k_pos, (seq_length + 1, d_model), jnp.float32) * 0.05
    gamma = 1.0 + 0.1 * jax.random.normal(k_g, (d_model,), jnp.float32)
    beta = 0.1 * jax.random.normal(k_be, (d_model,), jnp.float32)

    ref = reference_forward(x, w_patch, b_patch, pos_table, gamma, beta)

    # f32 operands: tight tolerance (also the path to use on v5e).
    out_f32 = jax.block_until_ready(
        patch_embedding_forward(x, w_patch, b_patch, pos_table, gamma, beta))
    assert out_f32.shape == (batch, seq_length, d_model)
    assert jnp.allclose(out_f32, ref, atol=1e-4, rtol=1e-4), "f32 mismatch vs reference"

    # bf16 matmul operands (v6e/v7x MXU path), f32 accumulation + f32 LN epilogue.
    out_bf16 = jax.block_until_ready(
        patch_embedding_forward(x, w_patch, b_patch, pos_table, gamma, beta,
                                operand_dtype=jnp.bfloat16))
    assert jnp.allclose(out_bf16, ref, atol=5e-2, rtol=5e-2), "bf16 mismatch vs reference"

    print("KERNEL_OK")
</pallas_src>

<mosaic_0001>
module attributes {stable_mosaic.version = 11 : i64} {
  func.func @_patch_embed_kernel(%arg0: i32, %arg1: memref<32x12xf32, #tpu.memory_space<vmem>>, %arg2: memref<12x128xf32, #tpu.memory_space<vmem>>, %arg3: memref<32x128xf32, #tpu.memory_space<vmem>>, %arg4: memref<1x128xf32, #tpu.memory_space<vmem>>, %arg5: memref<1x128xf32, #tpu.memory_space<vmem>>, %arg6: memref<32x128xf32, #tpu.memory_space<vmem>>) attributes {dimension_semantics = [#tpu.dimension_semantics<parallel>], iteration_bounds = array<i64: 1>, scalar_prefetch = 0 : i64, scratch_operands = 0 : i64, tpu.core_type = #tpu.core_type<tc>, window_params = [{transform_indices = @transform_0, window_bounds = array<i64: 32, 12>}, {pipeline_mode = #tpu.pipeline_mode<synchronous>, transform_indices = @transform_1, window_bounds = array<i64: 12, 128>}, {pipeline_mode = #tpu.pipeline_mode<synchronous>, transform_indices = @transform_2, window_bounds = array<i64: 32, 128>}, {pipeline_mode = #tpu.pipeline_mode<synchronous>, transform_indices = @transform_3, window_bounds = array<i64: 1, 128>}, {pipeline_mode = #tpu.pipeline_mode<synchronous>, transform_indices = @transform_4, window_bounds = array<i64: 1, 128>}, {transform_indices = @transform_5, window_bounds = array<i64: 32, 128>}]} {
    %c0 = arith.constant 0 : index
    %c0_0 = arith.constant 0 : index
    %0 = vector.load %arg1[%c0, %c0_0] : memref<32x12xf32, #tpu.memory_space<vmem>>, vector<32x12xf32>
    %c0_1 = arith.constant 0 : index
    %c0_2 = arith.constant 0 : index
    %1 = vector.load %arg2[%c0_1, %c0_2] : memref<12x128xf32, #tpu.memory_space<vmem>>, vector<12x128xf32>
    %cst = arith.constant dense<0.000000e+00> : vector<32x128xf32>
    %2 = tpu.matmul %0, %1, %cst {dimension_numbers = #tpu.dot_dimension_numbers<[1], [0], [0], [1], [0, 0, 1, 1], [], []>} : vector<32x12xf32>, vector<12x128xf32>, vector<32x128xf32> -> vector<32x128xf32>
    %c0_3 = arith.constant 0 : index
    %c0_4 = arith.constant 0 : index
    %3 = vector.load %arg3[%c0_3, %c0_4] : memref<32x128xf32, #tpu.memory_space<vmem>>, vector<32x128xf32>
    %4 = arith.addf %2, %3 : vector<32x128xf32>
    %cst_5 = arith.constant dense<0.000000e+00> : vector<32xf32>
    %5 = vector.multi_reduction <add>, %4, %cst_5 [1] : vector<32x128xf32> to vector<32xf32>
    %6 = vector.shape_cast %5 : vector<32xf32> to vector<32x1xf32>
    %7 = arith.mulf %4, %4 : vector<32x128xf32>
    %cst_6 = arith.constant dense<0.000000e+00> : vector<32xf32>
    %8 = vector.multi_reduction <add>, %7, %cst_6 [1] : vector<32x128xf32> to vector<32xf32>
    %9 = vector.shape_cast %8 : vector<32xf32> to vector<32x1xf32>
    %cst_7 = arith.constant 3.125000e-02 : f32
    %10 = vector.broadcast %cst_7 : f32 to vector<32x1xf32>
    %11 = arith.mulf %6, %10 : vector<32x1xf32>
    %cst_8 = arith.constant 3.125000e-02 : f32
    %12 = vector.broadcast %cst_8 : f32 to vector<32x1xf32>
    %13 = arith.mulf %9, %12 : vector<32x1xf32>
    %14 = arith.mulf %11, %11 : vector<32x1xf32>
    %15 = arith.subf %13, %14 : vector<32x1xf32>
    %cst_9 = arith.constant 9.99999974E-6 : f32
    %16 = vector.broadcast %cst_9 : f32 to vector<32x1xf32>
    %17 = arith.addf %15, %16 : vector<32x1xf32>
    %18 = math.rsqrt %17 : vector<32x1xf32>
    %19 = vector.broadcast %11 : vector<32x1xf32> to vector<32x128xf32>
    %20 = arith.subf %4, %19 : vector<32x128xf32>
    %21 = vector.broadcast %18 : vector<32x1xf32> to vector<32x128xf32>
    %22 = arith.mulf %20, %21 : vector<32x128xf32>
    %c0_10 = arith.constant 0 : index
    %c0_11 = arith.constant 0 : index
    %23 = vector.load %arg4[%c0_10, %c0_11] : memref<1x128xf32, #tpu.memory_space<vmem>>, vector<1x128xf32>
    %24 = vector.broadcast %23 : vector<1x128xf32> to vector<32x128xf32>
    %25 = arith.mulf %22, %24 : vector<32x128xf32>
    %c0_12 = arith.constant 0 : index
    %c0_13 = arith.constant 0 : index
    %26 = vector.load %arg5[%c0_12, %c0_13] : memref<1x128xf32, #tpu.memory_space<vmem>>, vector<1x128xf32>
    %27 = vector.broadcast %26 : vector<1x128xf32> to vector<32x128xf32>
    %28 = arith.addf %25, %27 : vector<32x128xf32>
    %c0_14 = arith.constant 0 : index
    %c0_15 = arith.constant 0 : index
    %29 = vector.load %arg6[%c0_14, %c0_15] : memref<32x128xf32, #tpu.memory_space<vmem>>, vector<32x128xf32>
    tpu.vector_store %arg6[%c0_14, %c0_15], %28 {strides = array<i32>} : memref<32x128xf32, #tpu.memory_space<vmem>>, vector<32x128xf32>,
    return
  }
  func.func @transform_0(%arg0: i32) -> (i32, i32) {
    %c0_i32 = arith.constant 0 : i32
    %c0_i32_0 = arith.constant 0 : i32
    return %arg0, %c0_i32 : i32, i32
  }
  func.func @transform_1(%arg0: i32) -> (i32, i32) {
    %c0_i32 = arith.constant 0 : i32
    %c0_i32_0 = arith.constant 0 : i32
    %c0_i32_1 = arith.constant 0 : i32
    return %c0_i32, %c0_i32_0 : i32, i32
  }
  func.func @transform_2(%arg0: i32) -> (i32, i32) {
    %c0_i32 = arith.constant 0 : i32
    %c0_i32_0 = arith.constant 0 : i32
    %c0_i32_1 = arith.constant 0 : i32
    return %c0_i32, %c0_i32_0 : i32, i32
  }
  func.func @transform_3(%arg0: i32) -> (i32, i32) {
    %c0_i32 = arith.constant 0 : i32
    %c0_i32_0 = arith.constant 0 : i32
    %c0_i32_1 = arith.constant 0 : i32
    return %c0_i32, %c0_i32_0 : i32, i32
  }
  func.func @transform_4(%arg0: i32) -> (i32, i32) {
    %c0_i32 = arith.constant 0 : i32
    %c0_i32_0 = arith.constant 0 : i32
    %c0_i32_1 = arith.constant 0 : i32
    return %c0_i32, %c0_i32_0 : i32, i32
  }
  func.func @transform_5(%arg0: i32) -> (i32, i32) {
    %c0_i32 = arith.constant 0 : i32
    %c0_i32_0 = arith.constant 0 : i32
    return %arg0, %c0_i32 : i32, i32
  }
}

</mosaic_0001>

<bundles_post_ra>
// kernel: tpu_custom_call.1
= control target key start
LH: loop header
LB: loop body
LE: loop exit
PB: predicated region body
PF: predicated region fallthrough
CT: control target
= control target key end

     0   :  { %vm44_vm0 = vcmask 1043456   ;;  %vm294_vm1 = vmmov 1   ;;  %vm31_vm3 = vcmask 97280   ;;  %s382_s0 = inlined_call_operand.vmem [shape: f32[32,12], index: 0, kind: input, shape index: {}]   ;;  %s383_s1 = inlined_call_operand.vmem [shape: f32[12,128], index: 1, kind: input, shape index: {}]   ;;  %s384_s2 = inlined_call_operand.vmem [shape: f32[32,128], index: 2, kind: input, shape index: {}]   ;;  %s385_s3 = inlined_call_operand.vmem [shape: f32[1,128], index: 3, kind: input, shape index: {}]   ;;  %s386_s4 = inlined_call_operand.vmem [shape: f32[1,128], index: 4, kind: input, shape index: {}]   ;;  %s387_s5 = inlined_call_operand.hbm [shape: f32[32,128], index: 5, kind: output, shape index: {}]  }
   0x1   :  { %v25_v0 = vld [vmem:[%s383_s1] sm:$0xff]  ;;  %v26_v1 = vld [vmem:[%s383_s1 + $0x8] sm:$0xf]  ;;  %vm251_vm2 = vmpackc.low %vm44_vm0, %vm294_vm1 }
   0x2   :  { %v21_v2 = vld [vmem:[%s382_s0] sm:$0xff]  ;;  %v250_v3 = vpack.c.bf16 %v26_v1, %v25_v0  ;;  %v23_v4 = vld [vmem:[%s382_s0 + $0x10] sm:$0xff] }
   0x3   :  { %244 = vmatprep.mubr.msk.f32.mxu0 %vm31_vm3, %v21_v2  ;;  %247 = vmatprep.mubr.msk.f32.mxu1 %vm31_vm3, %v23_v4 }
   0x4   :  { %10 = vsyncpa [#allocation3], 0  ;;  %252 = vmatprep.subr.msk.bf16.mxu0 %vm251_vm2, %v250_v3  ;;  %256 = vmatprep.subr.msk.bf16.mxu1 %vm251_vm2, %v250_v3  ;;  %v22_v5 = vld [vmem:[%s382_s0 + $0x8] sm:$0xff]  ;;  %v24_v6 = vld [vmem:[%s382_s0 + $0x18] sm:$0xff]  ;;  %s295_s14 = smov [#allocation2]  }
   0x5   :  { %255 = vmatpush3.bf16.msk.msra.mxu0 %vm251_vm2, %v250_v3  ;;  %257 = vmatpush3.bf16.msk.msra.mxu1 %vm251_vm2, %v250_v3  ;;  %v28_v7 = vld [vmem:[%s384_s2 + $0x8] sm:$0xff]  ;;  %v30_v8 = vld [vmem:[%s384_s2 + $0x18] sm:$0xff]  ;;  %v27_v15 = vld [vmem:[%s384_s2] sm:$0xff] }
   0x6   :  { %v29_v16 = vld [vmem:[%s384_s2 + $0x10] sm:$0xff]  ;;  %v232_v54 = vld [vmem:[%s385_s3] ss:$0 sm:$0xff]  ;;  %s216_s3 = sshll.u32 %s295_s14, 4  ;;  %s217_s3 = int_to_ptr.vmem [resolvable:$true] %s216_s3 }
   0x7   :  { %v233_v58 = vld [vmem:[%s386_s4] ss:$0 sm:$0xff]  ;;  %s270_s4 = scalar_lea.vmem %s217_s3, 512  ;;  %p275_p1 = scmp.lt.s32.totalorder %s217_s3, %s217_s3 }
   0x8   :  { %245 = vmatmul.mubr.msk.f32.vlgmr.msra.gmra.mrb[0].mxu0 %vm31_vm3, %v22_v5  ;;  %248 = vmatmul.mubr.msk.f32.vlgmr.msra.gmra.mrb[0].mxu1 %vm31_vm3, %v24_v6  ;;  %p271_p0 = scmp.ne.s32.totalorder %s217_s3, %s270_s4  ;;  %p276_p2 = scmp.lt.s32.totalorder %s270_s4, %s270_s4 }
   0xa   :  { %p277_p3 = por %p276_p2, %p275_p1 }
   0xc   :  { %p278_p4 = pnand %p277_p3, %p271_p0 }
  0xdb   :  { %v246_v9 = vpop.f32.mrb[0].mxu0  ;;  %v249_v10 = vpop.f32.mrb[0].mxu1 }
  0xdc   :  { %v120_v11 = vadd.f32 %v246_v9, %v28_v7  ;;  %v352_v12 = vadd.f32 %v249_v10, %v30_v8  ;;  %v114_v13 = vpop.f32.mrb[1].mxu0  ;;  %v124_v14 = vpop.f32.mrb[1].mxu1 }
  0xdd   :  { %v115_v17 = vadd.f32 %v114_v13, %v27_v15  ;;  %v125_v18 = vadd.f32 %v124_v14, %v29_v16 }
  0xde   :  { %139 = vadd.xlane.f32.xlu1 %v352_v12  ;;  %135 = vadd.xlane.f32.xlu0 %v120_v11  ;;  %v142_v19 = vmul.f32 %v120_v11, %v120_v11  ;;  %v144_v21 = vmul.f32 %v352_v12, %v352_v12 }
  0xdf   :  { %v141_v20 = vmul.f32 %v115_v17, %v115_v17  ;;  %v143_v22 = vmul.f32 %v125_v18, %v125_v18 }
  0xe2   :  { %137 = vadd.xlane.f32.xlu1 %v125_v18  ;;  %133 = vadd.xlane.f32.xlu0 %v115_v17 }
  0xe6   :  { %147 = vadd.xlane.f32.xlu1 %v142_v19  ;;  %145 = vadd.xlane.f32.xlu0 %v141_v20 }
  0xea   :  { %151 = vadd.xlane.f32.xlu1 %v144_v21  ;;  %149 = vadd.xlane.f32.xlu0 %v143_v22 }
 0x16b   :  { %v140_v23 = vpop.xlane.xlu1 %139  ;;  %v136_v24 = vpop.xlane.xlu0 %135 }
 0x16c   :  { %v154_v27 = vmul.f32 0.03125, %v136_v24  ;;  %v156_v29 = vmul.f32 0.03125, %v140_v23 }
 0x16e   :  { %v162_v33 = vmul.f32 %v154_v27, %v154_v27  ;;  %v164_v39 = vmul.f32 %v156_v29, %v156_v29  ;;  %v178_v51 = vsub.f32 %v120_v11, %v154_v27  ;;  %v180_v59 = vsub.f32 %v352_v12, %v156_v29 }
 0x16f   :  { %v138_v25 = vpop.xlane.xlu1 %137  ;;  %v134_v26 = vpop.xlane.xlu0 %133 }
 0x170   :  { %v153_v28 = vmul.f32 0.03125, %v134_v26  ;;  %v155_v30 = vmul.f32 0.03125, %v138_v25 }
 0x172   :  { %v161_v34 = vmul.f32 %v153_v28, %v153_v28  ;;  %v163_v40 = vmul.f32 %v155_v30, %v155_v30  ;;  %v177_v53 = vsub.f32 %v115_v17, %v153_v28  ;;  %v179_v62 = vsub.f32 %v125_v18, %v155_v30 }
 0x173   :  { %v148_v31 = vpop.xlane.xlu1 %147  ;;  %v146_v32 = vpop.xlane.xlu0 %145 }
 0x174   :  { %v158_v35 = vmul.f32 0.03125, %v148_v31  ;;  %v157_v36 = vmul.f32 0.03125, %v146_v32 }
 0x176   :  { %v166_v37 = vsub.f32 %v158_v35, %v162_v33  ;;  %v165_v38 = vsub.f32 %v157_v36, %v161_v34 }
 0x177   :  { %v152_v41 = vpop.xlane.xlu1 %151  ;;  %v150_v42 = vpop.xlane.xlu0 %149 }
 0x178   :  { %v170_v43 = vadd.f32 1e-05, %v166_v37  ;;  %v169_v44 = vadd.f32 1e-05, %v165_v38  ;;  %v160_v45 = vmul.f32 0.03125, %v152_v41  ;;  %v159_v46 = vmul.f32 0.03125, %v150_v42 }
 0x17a   :  { %262 = vrsqrt.f32 %v170_v43  ;;  %v168_v47 = vsub.f32 %v160_v45, %v164_v39  ;;  %v167_v48 = vsub.f32 %v159_v46, %v163_v40 }
 0x17b   :  { %264 = vrsqrt.f32 %v169_v44 }
 0x17c   :  { %v172_v49 = vadd.f32 1e-05, %v168_v47  ;;  %v171_v50 = vadd.f32 1e-05, %v167_v48 }
 0x17e   :  { %266 = vrsqrt.f32 %v172_v49 }
 0x17f   :  { %268 = vrsqrt.f32 %v171_v50 }
 0x184   :  { %v263_v52 = vpop.eup %262 }
 0x185   :  { %v265_v55 = vpop.eup %264  ;;  %v182_v56 = vmul.f32 %v263_v52, %v178_v51 }
 0x186   :  { %v181_v57 = vmul.f32 %v265_v55, %v177_v53 }
 0x187   :  { %v193_v60 = vmul.f32 %v232_v54, %v182_v56 }
 0x188   :  { %v267_v61 = vpop.eup %266  ;;  %v192_v63 = vmul.f32 %v232_v54, %v181_v57 }
 0x189   :  { %v269_v0 = vpop.eup %268  ;;  %v184_v1 = vmul.f32 %v267_v61, %v180_v59  ;;  %v204_v2 = vadd.f32 %v233_v58, %v193_v60 }
 0x18a   :  { %v183_v3 = vmul.f32 %v269_v0, %v179_v62  ;;  %v203_v4 = vadd.f32 %v233_v58, %v192_v63 }
 0x18b   :  { %v195_v5 = vmul.f32 %v232_v54, %v184_v1  ;;  %208 = vst [vmem:[#allocation2 + $0x8] sm:$0xff] %v204_v2 }
 0x18c   :  { %v194_v6 = vmul.f32 %v232_v54, %v183_v3  ;;  %207 = vst [vmem:[#allocation2] sm:$0xff] %v203_v4 }
 0x18d   :  { %v206_v7 = vadd.f32 %v233_v58, %v195_v5 }
 0x18e   :  { %v205_v8 = vadd.f32 %v233_v58, %v194_v6 }
 0x18f   :  { %210 = vst [vmem:[#allocation2 + $0x18] sm:$0xff] %v206_v7 }
 0x190   :  { %209 = vst [vmem:[#allocation2 + $0x10] sm:$0xff] %v205_v8 }
 0x191   :  { %281 = shalt.err (!%p278_p4)
}
 0x192   :  { %s282_s17 = scalar_lea.hbm %s387_s5, 512 }
 0x193   :  { %p283_p5 = scmp.ne.s32.totalorder %s387_s5, %s282_s17  ;;  %p286_p6 = scmp.lt.u32.totalorder %s282_s17, %s387_s5 }
 0x195   :  { %p288_p7 = pnand %p286_p6, %p283_p5 }
 0x197   :  { %291 = shalt.err (!%p288_p7)
}
 0x198   :  { %s296_s22 = smov 128   ;;  %s297_s23 = smov 8  }
 0x199   :  { %222 = dma.vmem_to_hbm [thread:$0]  %s217_s3, 512, %s387_s5, [#allocation3], %s296_s22, %s296_s22, %s297_s23  }
 0x19a   :  { %292 = dma.done.wait [#allocation3], 512  }
 0x19b   :  { %293 = vsyncadd [#allocation3], 4294966784 }
 0x19c   :  { %226 = vsyncpa [#allocation3], 1 }

</bundles_post_ra>
